<compile_context>
chip_gen: v7x
topology: tpu7x:2x2x1
jax: 0.10.0
libtpu: 0.0.40
codegen_flags: <defaults>
</compile_context>

<pallas_src>
import jax
import jax.numpy as jnp
from jax.experimental import pallas as pl
from jax.experimental.pallas import tpu as pltpu

NUM_FEATURES = 13
LAYER_DIMS = [NUM_FEATURES, 64, 32, 16, 8, 4, 2]
LANE = 128


def census_mlp_kernel(x_ref,
                      w1_ref, b1_ref, w2_ref, b2_ref, w3_ref, b3_ref,
                      w4_ref, b4_ref, w5_ref, b5_ref, w6_ref, b6_ref,
                      o_ref):
    """Feature-major fused MLP.

    x_ref : (13, TB) f32   -- batch on the lane axis (lane-dense).
    wK_ref: (out_K, in_K) f32 (torch nn.Linear layout), VMEM-resident.
    bK_ref: (out_K, 1)  f32, VMEM-resident.
    o_ref : (2, TB) f32    -- lane-dense logits.
    """

    def layer(h, w_ref, b_ref, relu):
        # (out, in) @ (in, TB) -> (out, TB); f32 accumulation on the MXU.
        y = jnp.dot(w_ref[...], h, preferred_element_type=jnp.float32)
        y = y + b_ref[...]                      # (out, 1) broadcasts over lanes
        return jnp.maximum(y, 0.0) if relu else y

    h = x_ref[...]
    h = layer(h, w1_ref, b1_ref, relu=True)
    h = layer(h, w2_ref, b2_ref, relu=True)
    h = layer(h, w3_ref, b3_ref, relu=True)
    h = layer(h, w4_ref, b4_ref, relu=True)
    h = layer(h, w5_ref, b5_ref, relu=True)
    h = layer(h, w6_ref, b6_ref, relu=False)    # final layer: raw logits
    o_ref[...] = h


def _round_up(n, m):
    return ((n + m - 1) // m) * m


def census_net_forward(x, params, tile_b=4096):
    """x: (B, ...) with prod of trailing dims == 13 (torch.flatten(x, 1)).
    params: list of (W, b) with W (out, in) and b (out,) -- torch layout."""
    B = x.shape[0]
    x2d = x.reshape(B, -1)
    assert x2d.shape[1] == NUM_FEATURES

    # Feature-major: one transpose in the wrapper puts the batch on the lane
    # axis so every in-kernel activation / store is lane-dense.
    xt = jnp.transpose(x2d).astype(jnp.float32)            # (13, B)

    b_lanes = _round_up(B, LANE)                            # lane-aligned batch
    TB = min(_round_up(tile_b, LANE), b_lanes)
    # v7x: keep >=2 grid steps when the batch allows so the "parallel" axis can
    # shard across both TensorCores (no-op on single-TC v5e/v6e).
    if b_lanes // TB < 2 and b_lanes >= 2 * LANE:
        TB = _round_up((b_lanes + 1) // 2, LANE)
    Bp = _round_up(b_lanes, TB)
    if Bp != B:
        xt = jnp.pad(xt, ((0, 0), (0, Bp - B)))             # zero-pad batch tail

    flat_params = []
    for (w, b) in params:
        flat_params.append(w.astype(jnp.float32))                  # (out, in)
        flat_params.append(b.reshape(-1, 1).astype(jnp.float32))   # (out, 1)

    def resident_spec(shape):
        # Constant block index -> block stays VMEM-resident across grid steps.
        return pl.BlockSpec(shape, lambda i: (0, 0))

    in_specs = [pl.BlockSpec((NUM_FEATURES, TB), lambda i: (0, i))]
    in_specs += [resident_spec(p.shape) for p in flat_params]
    out_spec = pl.BlockSpec((LAYER_DIMS[-1], TB), lambda i: (0, i))
    out_shape = jax.ShapeDtypeStruct((LAYER_DIMS[-1], Bp), jnp.float32)

    out = pl.pallas_call(
        census_mlp_kernel,
        out_shape=out_shape,
        grid=(Bp // TB,),
        in_specs=in_specs,
        out_specs=out_spec,
        compiler_params=pltpu.CompilerParams(
            dimension_semantics=("parallel",)),   # v7x megacore; no-op v5e/v6e
    )(xt, *flat_params)

    return jnp.transpose(out)[:B]                 # (B, 2)


def init_params(key):
    """Deterministic PyTorch-style (uniform +/- 1/sqrt(fan_in)) init,
    torch nn.Linear layout: W (out, in), b (out,)."""
    params = []
    for i in range(len(LAYER_DIMS) - 1):
        fan_in, fan_out = LAYER_DIMS[i], LAYER_DIMS[i + 1]
        key, kw, kb = jax.random.split(key, 3)
        bound = 1.0 / jnp.sqrt(fan_in)
        w = jax.random.uniform(kw, (fan_out, fan_in), jnp.float32, -bound, bound)
        b = jax.random.uniform(kb, (fan_out,), jnp.float32, -bound, bound)
        params.append((w, b))
    return params


def reference_forward(x, params):
    """Pure-JAX f32 reference with PyTorch nn.Linear semantics."""
    h = x.reshape(x.shape[0], -1).astype(jnp.float32)
    for i, (w, b) in enumerate(params):
        h = jnp.dot(h, w.T, preferred_element_type=jnp.float32) + b
        if i < len(params) - 1:
            h = jnp.maximum(h, 0.0)
    return h


if __name__ == "__main__":
    key = jax.random.PRNGKey(0)
    pkey, xkey, xkey2 = jax.random.split(key, 3)

    params = init_params(pkey)

    # Small batch: single grid step, padded up to one 128-lane tile.
    batch = 32
    x = jax.random.normal(xkey, (batch, NUM_FEATURES), dtype=jnp.float32)
    ref = reference_forward(x, params)
    out = jax.block_until_ready(census_net_forward(x, params))
    assert out.shape == (batch, 2), out.shape
    # Small tolerance: default-precision MXU matmuls in kernel vs. XLA may
    # differ slightly in accumulation/rounding order.
    assert jnp.allclose(out, ref, atol=1e-3, rtol=1e-3), (
        f"max abs err {jnp.max(jnp.abs(out - ref))}")

    # Larger batch with a trailing singleton dim (exercises torch.flatten(x, 1)),
    # default tile: v7x >=2-step cap kicks in -> grid=(2,).
    batch2 = 512
    x2 = jax.random.normal(xkey2, (batch2, 1, NUM_FEATURES), dtype=jnp.float32)
    ref2 = reference_forward(x2, params)
    out2 = jax.block_until_ready(census_net_forward(x2, params))
    assert out2.shape == (batch2, 2), out2.shape
    assert jnp.allclose(out2, ref2, atol=1e-3, rtol=1e-3), (
        f"max abs err {jnp.max(jnp.abs(out2 - ref2))}")

    # Same batch with a small tile: multi-step grid=(4,), VMEM-resident weights.
    out2_tiled = jax.block_until_ready(census_net_forward(x2, params, tile_b=128))
    assert jnp.allclose(out2_tiled, ref2, atol=1e-3, rtol=1e-3), (
        f"max abs err {jnp.max(jnp.abs(out2_tiled - ref2))}")

    print("KERNEL_OK")
</pallas_src>

<mosaic_0001>
module attributes {stable_mosaic.version = 11 : i64} {
  func.func @census_mlp_kernel(%arg0: i32, %arg1: memref<13x128xf32, #tpu.memory_space<vmem>>, %arg2: memref<64x13xf32, #tpu.memory_space<vmem>>, %arg3: memref<64x1xf32, #tpu.memory_space<vmem>>, %arg4: memref<32x64xf32, #tpu.memory_space<vmem>>, %arg5: memref<32x1xf32, #tpu.memory_space<vmem>>, %arg6: memref<16x32xf32, #tpu.memory_space<vmem>>, %arg7: memref<16x1xf32, #tpu.memory_space<vmem>>, %arg8: memref<8x16xf32, #tpu.memory_space<vmem>>, %arg9: memref<8x1xf32, #tpu.memory_space<vmem>>, %arg10: memref<4x8xf32, #tpu.memory_space<vmem>>, %arg11: memref<4x1xf32, #tpu.memory_space<vmem>>, %arg12: memref<2x4xf32, #tpu.memory_space<vmem>>, %arg13: memref<2x1xf32, #tpu.memory_space<vmem>>, %arg14: memref<2x128xf32, #tpu.memory_space<vmem>>) attributes {dimension_semantics = [#tpu.dimension_semantics<parallel>], iteration_bounds = array<i64: 1>, scalar_prefetch = 0 : i64, scratch_operands = 0 : i64, tpu.core_type = #tpu.core_type<tc>, window_params = [{transform_indices = @transform_0, window_bounds = array<i64: 13, 128>}, {pipeline_mode = #tpu.pipeline_mode<synchronous>, transform_indices = @transform_1, window_bounds = array<i64: 64, 13>}, {pipeline_mode = #tpu.pipeline_mode<synchronous>, transform_indices = @transform_2, window_bounds = array<i64: 64, 1>}, {pipeline_mode = #tpu.pipeline_mode<synchronous>, transform_indices = @transform_3, window_bounds = array<i64: 32, 64>}, {pipeline_mode = #tpu.pipeline_mode<synchronous>, transform_indices = @transform_4, window_bounds = array<i64: 32, 1>}, {pipeline_mode = #tpu.pipeline_mode<synchronous>, transform_indices = @transform_5, window_bounds = array<i64: 16, 32>}, {pipeline_mode = #tpu.pipeline_mode<synchronous>, transform_indices = @transform_6, window_bounds = array<i64: 16, 1>}, {pipeline_mode = #tpu.pipeline_mode<synchronous>, transform_indices = @transform_7, window_bounds = array<i64: 8, 16>}, {pipeline_mode = #tpu.pipeline_mode<synchronous>, transform_indices = @transform_8, window_bounds = array<i64: 8, 1>}, {pipeline_mode = #tpu.pipeline_mode<synchronous>, transform_indices = @transform_9, window_bounds = array<i64: 4, 8>}, {pipeline_mode = #tpu.pipeline_mode<synchronous>, transform_indices = @transform_10, window_bounds = array<i64: 4, 1>}, {pipeline_mode = #tpu.pipeline_mode<synchronous>, transform_indices = @transform_11, window_bounds = array<i64: 2, 4>}, {pipeline_mode = #tpu.pipeline_mode<synchronous>, transform_indices = @transform_12, window_bounds = array<i64: 2, 1>}, {transform_indices = @transform_13, window_bounds = array<i64: 2, 128>}]} {
    %c0 = arith.constant 0 : index
    %c0_0 = arith.constant 0 : index
    %0 = vector.load %arg1[%c0, %c0_0] : memref<13x128xf32, #tpu.memory_space<vmem>>, vector<13x128xf32>
    %c0_1 = arith.constant 0 : index
    %c0_2 = arith.constant 0 : index
    %1 = vector.load %arg2[%c0_1, %c0_2] : memref<64x13xf32, #tpu.memory_space<vmem>>, vector<64x13xf32>
    %cst = arith.constant dense<0.000000e+00> : vector<64x128xf32>
    %2 = tpu.matmul %1, %0, %cst {dimension_numbers = #tpu.dot_dimension_numbers<[1], [0], [0], [1], [0, 0, 1, 1], [], []>} : vector<64x13xf32>, vector<13x128xf32>, vector<64x128xf32> -> vector<64x128xf32>
    %c0_3 = arith.constant 0 : index
    %c0_4 = arith.constant 0 : index
    %3 = vector.load %arg3[%c0_3, %c0_4] : memref<64x1xf32, #tpu.memory_space<vmem>>, vector<64x1xf32>
    %4 = vector.broadcast %3 : vector<64x1xf32> to vector<64x128xf32>
    %5 = arith.addf %2, %4 : vector<64x128xf32>
    %cst_5 = arith.constant 0.000000e+00 : f32
    %6 = vector.broadcast %cst_5 : f32 to vector<64x128xf32>
    %7 = arith.maximumf %5, %6 : vector<64x128xf32>
    %c0_6 = arith.constant 0 : index
    %c0_7 = arith.constant 0 : index
    %8 = vector.load %arg4[%c0_6, %c0_7] : memref<32x64xf32, #tpu.memory_space<vmem>>, vector<32x64xf32>
    %cst_8 = arith.constant dense<0.000000e+00> : vector<32x128xf32>
    %9 = tpu.matmul %8, %7, %cst_8 {dimension_numbers = #tpu.dot_dimension_numbers<[1], [0], [0], [1], [0, 0, 1, 1], [], []>} : vector<32x64xf32>, vector<64x128xf32>, vector<32x128xf32> -> vector<32x128xf32>
    %c0_9 = arith.constant 0 : index
    %c0_10 = arith.constant 0 : index
    %10 = vector.load %arg5[%c0_9, %c0_10] : memref<32x1xf32, #tpu.memory_space<vmem>>, vector<32x1xf32>
    %11 = vector.broadcast %10 : vector<32x1xf32> to vector<32x128xf32>
    %12 = arith.addf %9, %11 : vector<32x128xf32>
    %cst_11 = arith.constant 0.000000e+00 : f32
    %13 = vector.broadcast %cst_11 : f32 to vector<32x128xf32>
    %14 = arith.maximumf %12, %13 : vector<32x128xf32>
    %c0_12 = arith.constant 0 : index
    %c0_13 = arith.constant 0 : index
    %15 = vector.load %arg6[%c0_12, %c0_13] : memref<16x32xf32, #tpu.memory_space<vmem>>, vector<16x32xf32>
    %cst_14 = arith.constant dense<0.000000e+00> : vector<16x128xf32>
    %16 = tpu.matmul %15, %14, %cst_14 {dimension_numbers = #tpu.dot_dimension_numbers<[1], [0], [0], [1], [0, 0, 1, 1], [], []>} : vector<16x32xf32>, vector<32x128xf32>, vector<16x128xf32> -> vector<16x128xf32>
    %c0_15 = arith.constant 0 : index
    %c0_16 = arith.constant 0 : index
    %17 = vector.load %arg7[%c0_15, %c0_16] : memref<16x1xf32, #tpu.memory_space<vmem>>, vector<16x1xf32>
    %18 = vector.broadcast %17 : vector<16x1xf32> to vector<16x128xf32>
    %19 = arith.addf %16, %18 : vector<16x128xf32>
    %cst_17 = arith.constant 0.000000e+00 : f32
    %20 = vector.broadcast %cst_17 : f32 to vector<16x128xf32>
    %21 = arith.maximumf %19, %20 : vector<16x128xf32>
    %c0_18 = arith.constant 0 : index
    %c0_19 = arith.constant 0 : index
    %22 = vector.load %arg8[%c0_18, %c0_19] : memref<8x16xf32, #tpu.memory_space<vmem>>, vector<8x16xf32>
    %cst_20 = arith.constant dense<0.000000e+00> : vector<8x128xf32>
    %23 = tpu.matmul %22, %21, %cst_20 {dimension_numbers = #tpu.dot_dimension_numbers<[1], [0], [0], [1], [0, 0, 1, 1], [], []>} : vector<8x16xf32>, vector<16x128xf32>, vector<8x128xf32> -> vector<8x128xf32>
    %c0_21 = arith.constant 0 : index
    %c0_22 = arith.constant 0 : index
    %24 = vector.load %arg9[%c0_21, %c0_22] : memref<8x1xf32, #tpu.memory_space<vmem>>, vector<8x1xf32>
    %25 = vector.broadcast %24 : vector<8x1xf32> to vector<8x128xf32>
    %26 = arith.addf %23, %25 : vector<8x128xf32>
    %cst_23 = arith.constant 0.000000e+00 : f32
    %27 = vector.broadcast %cst_23 : f32 to vector<8x128xf32>
    %28 = arith.maximumf %26, %27 : vector<8x128xf32>
    %c0_24 = arith.constant 0 : index
    %c0_25 = arith.constant 0 : index
    %29 = vector.load %arg10[%c0_24, %c0_25] : memref<4x8xf32, #tpu.memory_space<vmem>>, vector<4x8xf32>
    %cst_26 = arith.constant dense<0.000000e+00> : vector<4x128xf32>
    %30 = tpu.matmul %29, %28, %cst_26 {dimension_numbers = #tpu.dot_dimension_numbers<[1], [0], [0], [1], [0, 0, 1, 1], [], []>} : vector<4x8xf32>, vector<8x128xf32>, vector<4x128xf32> -> vector<4x128xf32>
    %c0_27 = arith.constant 0 : index
    %c0_28 = arith.constant 0 : index
    %31 = vector.load %arg11[%c0_27, %c0_28] : memref<4x1xf32, #tpu.memory_space<vmem>>, vector<4x1xf32>
    %32 = vector.broadcast %31 : vector<4x1xf32> to vector<4x128xf32>
    %33 = arith.addf %30, %32 : vector<4x128xf32>
    %cst_29 = arith.constant 0.000000e+00 : f32
    %34 = vector.broadcast %cst_29 : f32 to vector<4x128xf32>
    %35 = arith.maximumf %33, %34 : vector<4x128xf32>
    %c0_30 = arith.constant 0 : index
    %c0_31 = arith.constant 0 : index
    %36 = vector.load %arg12[%c0_30, %c0_31] : memref<2x4xf32, #tpu.memory_space<vmem>>, vector<2x4xf32>
    %cst_32 = arith.constant dense<0.000000e+00> : vector<2x128xf32>
    %37 = tpu.matmul %36, %35, %cst_32 {dimension_numbers = #tpu.dot_dimension_numbers<[1], [0], [0], [1], [0, 0, 1, 1], [], []>} : vector<2x4xf32>, vector<4x128xf32>, vector<2x128xf32> -> vector<2x128xf32>
    %c0_33 = arith.constant 0 : index
    %c0_34 = arith.constant 0 : index
    %38 = vector.load %arg13[%c0_33, %c0_34] : memref<2x1xf32, #tpu.memory_space<vmem>>, vector<2x1xf32>
    %39 = vector.broadcast %38 : vector<2x1xf32> to vector<2x128xf32>
    %40 = arith.addf %37, %39 : vector<2x128xf32>
    %c0_35 = arith.constant 0 : index
    %c0_36 = arith.constant 0 : index
    %41 = vector.load %arg14[%c0_35, %c0_36] : memref<2x128xf32, #tpu.memory_space<vmem>>, vector<2x128xf32>
    tpu.vector_store %arg14[%c0_35, %c0_36], %40 {strides = array<i32>} : memref<2x128xf32, #tpu.memory_space<vmem>>, vector<2x128xf32>,
    return
  }
  func.func @transform_0(%arg0: i32) -> (i32, i32) {
    %c0_i32 = arith.constant 0 : i32
    %c0_i32_0 = arith.constant 0 : i32
    return %c0_i32, %arg0 : i32, i32
  }
  func.func @transform_1(%arg0: i32) -> (i32, i32) {
    %c0_i32 = arith.constant 0 : i32
    %c0_i32_0 = arith.constant 0 : i32
    %c0_i32_1 = arith.constant 0 : i32
    return %c0_i32, %c0_i32_0 : i32, i32
  }
  func.func @transform_2(%arg0: i32) -> (i32, i32) {
    %c0_i32 = arith.constant 0 : i32
    %c0_i32_0 = arith.constant 0 : i32
    %c0_i32_1 = arith.constant 0 : i32
    return %c0_i32, %c0_i32_0 : i32, i32
  }
  func.func @transform_3(%arg0: i32) -> (i32, i32) {
    %c0_i32 = arith.constant 0 : i32
    %c0_i32_0 = arith.constant 0 : i32
    %c0_i32_1 = arith.constant 0 : i32
    return %c0_i32, %c0_i32_0 : i32, i32
  }
  func.func @transform_4(%arg0: i32) -> (i32, i32) {
    %c0_i32 = arith.constant 0 : i32
    %c0_i32_0 = arith.constant 0 : i32
    %c0_i32_1 = arith.constant 0 : i32
    return %c0_i32, %c0_i32_0 : i32, i32
  }
  func.func @transform_5(%arg0: i32) -> (i32, i32) {
    %c0_i32 = arith.constant 0 : i32
    %c0_i32_0 = arith.constant 0 : i32
    %c0_i32_1 = arith.constant 0 : i32
    return %c0_i32, %c0_i32_0 : i32, i32
  }
  func.func @transform_6(%arg0: i32) -> (i32, i32) {
    %c0_i32 = arith.constant 0 : i32
    %c0_i32_0 = arith.constant 0 : i32
    %c0_i32_1 = arith.constant 0 : i32
    return %c0_i32, %c0_i32_0 : i32, i32
  }
  func.func @transform_7(%arg0: i32) -> (i32, i32) {
    %c0_i32 = arith.constant 0 : i32
    %c0_i32_0 = arith.constant 0 : i32
    %c0_i32_1 = arith.constant 0 : i32
    return %c0_i32, %c0_i32_0 : i32, i32
  }
  func.func @transform_8(%arg0: i32) -> (i32, i32) {
    %c0_i32 = arith.constant 0 : i32
    %c0_i32_0 = arith.constant 0 : i32
    %c0_i32_1 = arith.constant 0 : i32
    return %c0_i32, %c0_i32_0 : i32, i32
  }
  func.func @transform_9(%arg0: i32) -> (i32, i32) {
    %c0_i32 = arith.constant 0 : i32
    %c0_i32_0 = arith.constant 0 : i32
    %c0_i32_1 = arith.constant 0 : i32
    return %c0_i32, %c0_i32_0 : i32, i32
  }
  func.func @transform_10(%arg0: i32) -> (i32, i32) {
    %c0_i32 = arith.constant 0 : i32
    %c0_i32_0 = arith.constant 0 : i32
    %c0_i32_1 = arith.constant 0 : i32
    return %c0_i32, %c0_i32_0 : i32, i32
  }
  func.func @transform_11(%arg0: i32) -> (i32, i32) {
    %c0_i32 = arith.constant 0 : i32
    %c0_i32_0 = arith.constant 0 : i32
    %c0_i32_1 = arith.constant 0 : i32
    return %c0_i32, %c0_i32_0 : i32, i32
  }
  func.func @transform_12(%arg0: i32) -> (i32, i32) {
    %c0_i32 = arith.constant 0 : i32
    %c0_i32_0 = arith.constant 0 : i32
    %c0_i32_1 = arith.constant 0 : i32
    return %c0_i32, %c0_i32_0 : i32, i32
  }
  func.func @transform_13(%arg0: i32) -> (i32, i32) {
    %c0_i32 = arith.constant 0 : i32
    %c0_i32_0 = arith.constant 0 : i32
    return %c0_i32, %arg0 : i32, i32
  }
}

</mosaic_0001>

<bundles_post_ra>
// kernel: tpu_custom_call.1
= control target key start
LH: loop header
LB: loop body
LE: loop exit
PB: predicated region body
PF: predicated region fallthrough
CT: control target
= control target key end

     0   :  { %vm128_vm0 = vcmask 1044480   ;;  %vm922_vm1 = vmmov 1   ;;  %vm103_vm3 = vcmask 105472   ;;  %v923_v4 = vmov 0   ;;  %s1135_s0 = inlined_call_operand.vmem [shape: f32[13,128], index: 0, kind: input, shape index: {}]   ;;  %s1136_s1 = inlined_call_operand.vmem [shape: f32[64,13], index: 1, kind: input, shape index: {}]   ;;  %s1137_s2 = inlined_call_operand.vmem [shape: f32[64,1], index: 2, kind: input, shape index: {}]   ;;  %s1138_s3 = inlined_call_operand.vmem [shape: f32[32,64], index: 3, kind: input, shape index: {}]   ;;  %s1139_s4 = inlined_call_operand.vmem [shape: f32[32,1], index: 4, kind: input, shape index: {}]   ;;  %s1140_s5 = inlined_call_operand.vmem [shape: f32[16,32], index: 5, kind: input, shape index: {}]   ;;  %s1141_s6 = inlined_call_operand.vmem [shape: f32[16,1], index: 6, kind: input, shape index: {}]   ;;  %s1142_s7 = inlined_call_operand.vmem [shape: f32[8,16], index: 7, kind: input, shape index: {}]   ;;  %s1143_s8 = inlined_call_operand.vmem [shape: f32[8,1], index: 8, kind: input, shape index: {}]   ;;  %s1144_s9 = inlined_call_operand.vmem [shape: f32[4,8], index: 9, kind: input, shape index: {}]   ;;  %s1145_s10 = inlined_call_operand.vmem [shape: f32[4,1], index: 10, kind: input, shape index: {}]   ;;  %s1146_s11 = inlined_call_operand.vmem [shape: f32[2,4], index: 11, kind: input, shape index: {}]   ;;  %s1147_s12 = inlined_call_operand.vmem [shape: f32[2,1], index: 12, kind: input, shape index: {}]   ;;  %s1148_s13 = inlined_call_operand.hbm [shape: f32[2,128], index: 13, kind: output, shape index: {}]  }
   0x1   :  { %v45_v0 = vld [vmem:[%s1135_s0] sm:$0xff]  ;;  %v46_v1 = vld [vmem:[%s1135_s0 + $0x8] sm:$0x1f]  ;;  %vm858_vm2 = vmpackc.low %vm128_vm0, %vm922_vm1  ;;  %896 = vset.pattern.permute.xlu0 %v923_v4  ;;  %897 = vset.pattern.permute.xlu1 %v923_v4 }
   0x2   :  { %v47_v2 = vld [vmem:[%s1136_s1] sm:$0xff]  ;;  %v857_v3 = vpack.c.bf16 %v46_v1, %v45_v0  ;;  %v48_v6 = vld [vmem:[%s1136_s1 + $0x8] sm:$0xff]  ;;  %v57_v7 = vld [vmem:[%s1137_s2 + $0x10] sm:$0xff] }
   0x3   :  { %795 = vmatprep.mubr.msk.f32.mxu0 %vm103_vm3, %v47_v2  ;;  %v55_v5 = vld [vmem:[%s1137_s2] sm:$0xff]  ;;  %v49_v8 = vld [vmem:[%s1136_s1 + $0x10] sm:$0xff]  ;;  %v56_v9 = vld [vmem:[%s1137_s2 + $0x8] sm:$0xff]  ;;  %75 = vperm.xlu1 %897, %v57_v7  }
   0x4   :  { %859 = vmatprep.subr.msk.bf16.mxu0 %vm858_vm2, %v857_v3  ;;  %65 = vperm.xlu0 %896, %v55_v5   ;;  %v58_v10 = vld [vmem:[%s1137_s2 + $0x18] sm:$0xff]  ;;  %v51_v12 = vld [vmem:[%s1136_s1 + $0x20] sm:$0xff] }
   0x5   :  { %862 = vmatpush3.bf16.msk.msra.mxu0 %vm858_vm2, %v857_v3  ;;  %v50_v11 = vld [vmem:[%s1136_s1 + $0x18] sm:$0xff]  ;;  %v59_v13 = vld [vmem:[%s1137_s2 + $0x20] sm:$0xff] }
   0x7   :  { %80 = vperm.xlu1 %897, %v58_v10  }
   0x8   :  { %796 = vmatmul.mubr.msk.f32.vlgmr.msra.gmra.mrb[0].mxu0 %vm103_vm3, %v48_v6  ;;  %70 = vperm.xlu0 %896, %v56_v9  }
   0x9   :  { %798 = vmatprep.mubr.msk.f32.mxu0 %vm103_vm3, %v49_v8 }
   0xa   :  { %18 = vsyncpa [#allocation3], 0  ;;  %v60_v14 = vld [vmem:[%s1137_s2 + $0x28] sm:$0xff]  ;;  %v53_v16 = vld [vmem:[%s1136_s1 + $0x30] sm:$0xff]  ;;  %vm273_vm4 = vcmask 523264   ;;  %vm389_vm5 = vcmask 261120  }
   0xb   :  { %v52_v15 = vld [vmem:[%s1136_s1 + $0x28] sm:$0xff]  ;;  %v61_v17 = vld [vmem:[%s1137_s2 + $0x30] sm:$0xff]  ;;  %90 = vperm.xlu1 %897, %v60_v14   ;;  %v62_v18 = vld [vmem:[%s1137_s2 + $0x38] sm:$0xff]  ;;  %vm925_vm6 = vmmov 0   ;;  %vm480_vm7 = vcmask 130048   ;;  %vm562_vm8 = vcmask 64512  }
   0xc   :  { %799 = vmatmul.mubr.msk.f32.gmra.mrb[2].mxu0 %vm103_vm3, %v50_v11  ;;  %85 = vperm.xlu0 %896, %v59_v13   ;;  %v54_v19 = vld [vmem:[%s1136_s1 + $0x38] sm:$0xff]  ;;  %v249_v20 = vld [vmem:[%s1139_s4] sm:$0xff]  ;;  %v250_v21 = vld [vmem:[%s1139_s4 + $0x8] sm:$0xff]  ;;  %vm648_vm9 = vcmask 1043456   ;;  %vm644_vm10 = vcmask 31744   ;;  %s927_s14 = smov [#allocation2]  }
   0xd   :  { %801 = vmatprep.mubr.msk.f32.mxu0 %vm103_vm3, %v51_v12  ;;  %v251_v22 = vld [vmem:[%s1139_s4 + $0x10] sm:$0xff]  ;;  %v252_v23 = vld [vmem:[%s1139_s4 + $0x18] sm:$0xff]  ;;  %v377_v24 = vld [vmem:[%s1141_s6] sm:$0xff]  ;;  %s729_s15 = sshll.u32 %s927_s14, 4  ;;  %s730_s15 = int_to_ptr.vmem [resolvable:$true] %s729_s15 }
   0xe   :  { %v378_v25 = vld [vmem:[%s1141_s6 + $0x8] sm:$0xff]  ;;  %v474_v26 = vld [vmem:[%s1143_s8] sm:$0xff]  ;;  %v247_v3 = vld [vmem:[%s1138_s3 + $0x10] sm:$0xff]  ;;  %p903_p1 = scmp.lt.s32.totalorder %s730_s15, %s730_s15 }
   0xf   :  { %100 = vperm.xlu1 %897, %v62_v18   ;;  %v556_v27 = vld [vmem:[%s1145_s10] sm:$0xf]  ;;  %v246_v2 = vld [vmem:[%s1138_s3 + $0x8] sm:$0xff]  ;;  %v248_v4 = vld [vmem:[%s1138_s3 + $0x18] sm:$0xff] }
  0x10   :  { %802 = vmatmul.mubr.msk.f32.gmra.mrb[4].mxu0 %vm103_vm3, %v52_v15  ;;  %95 = vperm.xlu0 %896, %v61_v17   ;;  %v638_v28 = vld [vmem:[%s1147_s12] sm:$0x3] }
  0x11   :  { %804 = vmatprep.mubr.msk.f32.mxu0 %vm103_vm3, %v53_v16  ;;  %v245_v29 = vld [vmem:[%s1138_s3] sm:$0xff] }
  0x12   :  { %823 = vmatprep.mubr.msk.f32.mxu1 %vm273_vm4, %v245_v29  ;;  %v375_v5 = vld [vmem:[%s1140_s5] sm:$0xff] }
  0x13   :  { %260 = vperm.xlu1 %897, %v250_v21  }
  0x14   :  { %805 = vmatmul.mubr.msk.f32.gmra.mrb[6].mxu0 %vm103_vm3, %v54_v19  ;;  %255 = vperm.xlu0 %896, %v249_v20  }
  0x15   :  { %837 = vmatprep.mubr.msk.f32.mxu0 %vm389_vm5, %v375_v5 }
  0x17   :  { %270 = vperm.xlu1 %897, %v252_v23  }
  0x18   :  { %265 = vperm.xlu0 %896, %v251_v22  }
  0x1b   :  { %386 = vperm.xlu1 %897, %v378_v25   ;;  %v924_v25 = vmov 0.0|0.0  }
  0x1c   :  { %381 = vperm.xlu0 %896, %v377_v24   ;;  %v376_v24 = vld [vmem:[%s1140_s5 + $0x8] sm:$0xff] }
  0x1f   :  { %559 = vperm.xlu1 %897, %v556_v27  }
  0x20   :  { %477 = vperm.xlu0 %896, %v474_v26   ;;  %v926_v26 = vmov 0.0  }
  0x24   :  { %641 = vperm.xlu0 %896, %v638_v28  }
  0x82   :  { %v76_v31 = vpop.permute.xlu1 %75 }
  0x83   :  { %v66_v30 = vpop.permute.xlu0 %65 }
  0x86   :  { %v81_v33 = vpop.permute.xlu1 %80 }
  0x87   :  { %v71_v32 = vpop.permute.xlu0 %70 }
  0x8a   :  { %v91_v43 = vpop.permute.xlu1 %90 }
  0x8b   :  { %v86_v46 = vpop.permute.xlu0 %85 }
  0x8e   :  { %v101_v55 = vpop.permute.xlu1 %100 }
  0x8f   :  { %v96_v58 = vpop.permute.xlu0 %95 }
  0x92   :  { %v261_v6 = vpop.permute.xlu1 %260 }
  0x93   :  { %v256_v7 = vpop.permute.xlu0 %255 }
  0x96   :  { %v271_v13 = vpop.permute.xlu1 %270 }
  0x97   :  { %v266_v16 = vpop.permute.xlu0 %265 }
  0x9a   :  { %v387_v27 = vpop.permute.xlu1 %386 }
  0x9b   :  { %v382_v29 = vpop.permute.xlu0 %381 }
  0xdb   :  { %v797_v34 = vpop.f32.mrb[0].mxu0 }
  0xdc   :  { %v204_v35 = vadd.f32 %v797_v34, %v71_v32  ;;  %v198_v36 = vpop.f32.mrb[1].mxu0 }
  0xdd   :  { %v199_v37 = vadd.f32 %v198_v36, %v66_v30  ;;  %v473_v36 = vld [vmem:[%s1142_s7] sm:$0xff] }
  0xde   :  { %v238_v38 = vmax.f32 %v204_v35, 0.0 }
  0xdf   :  { %v237_v39 = vmax.f32 %v199_v37, 0.0  ;;  %v800_v40 = vpop.f32.mrb[2].mxu0  ;;  %v478_v37 = vpop.permute.xlu0 %477 }
  0xe0   :  { %v214_v41 = vadd.f32 %v800_v40, %v81_v33  ;;  %v208_v42 = vpop.f32.mrb[3].mxu0 }
  0xe1   :  { %v209_v44 = vadd.f32 %v208_v42, %v76_v31  ;;  %v863_v45 = vpack.c.bf16 %v238_v38, %v237_v39  ;;  %v555_v42 = vld [vmem:[%s1144_s9] sm:$0xf]  ;;  %s898_s9 = scalar_lea.vmem %s730_s15, 32 }
  0xe2   :  { %v240_v47 = vmax.f32 %v214_v41, 0.0  ;;  %p899_p0 = scmp.ne.s32.totalorder %s730_s15, %s898_s9  ;;  %p904_p2 = scmp.lt.s32.totalorder %s898_s9, %s898_s9 }
  0xe3   :  { %v239_v48 = vmax.f32 %v209_v44, 0.0  ;;  %v803_v49 = vpop.f32.mrb[4].mxu0  ;;  %864 = vmatprep.subr.bf16.mxu1 %v863_v45 }
  0xe4   :  { %v224_v50 = vadd.f32 %v803_v49, %v91_v43  ;;  %v218_v51 = vpop.f32.mrb[5].mxu0  ;;  %866 = vmatpush3.bf16.msra.mxu1 %v863_v45  ;;  %v560_v43 = vpop.permute.xlu1 %559  ;;  %p905_p3 = por %p904_p2, %p903_p1 }
  0xe5   :  { %v867_v52 = vpack.c.bf16 %v240_v47, %v239_v48  ;;  %v219_v53 = vadd.f32 %v218_v51, %v86_v46  ;;  %v637_v48 = vld [vmem:[%s1146_s11] sm:$0x3]  ;;  %v642_v49 = vpop.permute.xlu0 %641 }
  0xe6   :  { %v242_v54 = vmax.f32 %v224_v50, 0.0  ;;  %p906_p4 = pnand %p905_p3, %p899_p0 }
  0xe7   :  { %v241_v56 = vmax.f32 %v219_v53, 0.0  ;;  %v806_v57 = vpop.f32.mrb[6].mxu0  ;;  %868 = vmatprep.subr.bf16.mxu1 %v867_v52 }
  0xe8   :  { %v234_v59 = vadd.f32 %v806_v57, %v101_v55  ;;  %v228_v60 = vpop.f32.mrb[7].mxu0  ;;  %870 = vmatpush3.bf16.msra.mxu1 %v867_v52 }
  0xe9   :  { %v871_v61 = vpack.c.bf16 %v242_v54, %v241_v56  ;;  %v229_v62 = vadd.f32 %v228_v60, %v96_v58 }
  0xea   :  { %v244_v63 = vmax.f32 %v234_v59, 0.0 }
  0xeb   :  { %v243_v0 = vmax.f32 %v229_v62, 0.0  ;;  %872 = vmatprep.subr.bf16.mxu1 %v871_v61 }
  0xec   :  { %874 = vmatpush3.bf16.msra.mxu1 %v871_v61 }
  0xed   :  { %v875_v1 = vpack.c.bf16 %v244_v63, %v243_v0 }
  0xef   :  { %876 = vmatprep.subr.bf16.mxu1 %v875_v1 }
  0xf0   :  { %878 = vmatpush3.bf16.msra.mxu1 %v875_v1 }
  0xf1   :  { %847 = vmatprep.subr.mxu1 %v926_v26 }
  0xf3   :  { %824 = vmatmul.mubr.msk.f32.vlgmr.msra.gmra.mrb[0].mxu1 %vm273_vm4, %v246_v2 }
  0xf4   :  { %826 = vmatprep.mubr.msk.f32.mxu1 %vm273_vm4, %v247_v3 }
  0xf7   :  { %827 = vmatmul.mubr.msk.f32.gmra.mrb[2].mxu1 %vm273_vm4, %v248_v4 }
  0xf8   :  { %849 = vmatprep.mubr.msk.f32.mxu1 %vm925_vm6, %v926_v26 }
 0x1c6   :  { %v825_v8 = vpop.f32.mrb[0].mxu1 }
 0x1c7   :  { %v358_v9 = vadd.f32 %v825_v8, %v261_v6  ;;  %v352_v10 = vpop.f32.mrb[1].mxu1 }
 0x1c8   :  { %v353_v11 = vadd.f32 %v352_v10, %v256_v7 }
 0x1c9   :  { %v372_v12 = vmax.f32 %v358_v9, 0.0 }
 0x1ca   :  { %v371_v14 = vmax.f32 %v353_v11, 0.0  ;;  %v828_v15 = vpop.f32.mrb[2].mxu1 }
 0x1cb   :  { %v368_v17 = vadd.f32 %v828_v15, %v271_v13  ;;  %v362_v18 = vpop.f32.mrb[3].mxu1 }
 0x1cc   :  { %v879_v19 = vpack.c.bf16 %v372_v12, %v371_v14  ;;  %v363_v20 = vadd.f32 %v362_v18, %v266_v16 }
 0x1cd   :  { %v374_v21 = vmax.f32 %v368_v17, 0.0 }
 0x1ce   :  { %v373_v22 = vmax.f32 %v363_v20, 0.0  ;;  %880 = vmatprep.subr.bf16.mxu0 %v879_v19 }
 0x1cf   :  { %882 = vmatpush3.bf16.msra.mxu0 %v879_v19 }
 0x1d0   :  { %v883_v23 = vpack.c.bf16 %v374_v21, %v373_v22 }
 0x1d2   :  { %884 = vmatprep.subr.bf16.mxu0 %v883_v23 }
 0x1d3   :  { %886 = vmatpush3.bf16.msra.mxu0 %v883_v23 }
 0x1d4   :  { %887 = vmatprep.subr.bf16.mxu0 %v924_v25 }
 0x1d6   :  { %838 = vmatmul.mubr.msk.f32.vlgmr.msra.gmra.mrb[8].mxu0 %vm389_vm5, %v376_v24 }
 0x1d7   :  { %844 = vmatprep.mubr.msk.f32.mxu0 %vm925_vm6, %v926_v26 }
 0x2a9   :  { %v839_v28 = vpop.f32.mrb[8].mxu0 }
 0x2aa   :  { %v468_v30 = vadd.f32 %v839_v28, %v387_v27  ;;  %v462_v31 = vpop.f32.mrb[9].mxu0 }
 0x2ab   :  { %v463_v32 = vadd.f32 %v462_v31, %v382_v29 }
 0x2ac   :  { %v472_v33 = vmax.f32 %v468_v30, 0.0 }
 0x2ad   :  { %v471_v34 = vmax.f32 %v463_v32, 0.0 }
 0x2af   :  { %v888_v35 = vpack.c.bf16 %v472_v33, %v471_v34 }
 0x2b1   :  { %889 = vmatpush3.bf16.msra.mxu0 %v888_v35 }
 0x2b2   :  { %852 = vmatprep.subr.mxu0 %v926_v26 }
 0x2b4   :  { %845 = vmatmul.mubr.msk.f32.vlgmr.msra.gmra.mrb[10].mxu0 %vm480_vm7, %v473_v36 }
 0x2b5   :  { %854 = vmatprep.mubr.msk.f32.mxu0 %vm925_vm6, %v926_v26 }
 0x387   :  { %v550_v38 = vpop.f32.mrb[10].mxu0 }
 0x388   :  { %v551_v39 = vadd.f32 %v550_v38, %v478_v37  ;;  %v846_v40 = vpop.f32.mrb[11].mxu0 }
 0x38a   :  { %v554_v41 = vmax.f32 %v551_v39, 0.0 }
 0x38c   :  { %848 = vmatpush3.msra.mxu1 %v554_v41 }
 0x38d   :  { %850 = vmatmul.mubr.msk.f32.vlgmr.msra.gmra.mrb[4].mxu1 %vm562_vm8, %v555_v42 }
 0x460   :  { %v632_v44 = vpop.f32.mrb[4].mxu1 }
 0x461   :  { %v633_v45 = vadd.f32 %v632_v44, %v560_v43  ;;  %v851_v46 = vpop.f32.mrb[5].mxu1 }
 0x463   :  { %v636_v47 = vmax.f32 %v633_v45, 0.0 }
 0x465   :  { %853 = vmatpush3.msk.msra.mxu0 %vm648_vm9, %v636_v47 }
 0x466   :  { %855 = vmatmul.mubr.msk.f32.vlgmr.msra.gmra.mrb[12].mxu0 %vm644_vm10, %v637_v48 }
 0x539   :  { %v718_v50 = vpop.f32.mrb[12].mxu0 }
 0x53a   :  { %v719_v51 = vadd.f32 %v718_v50, %v642_v49  ;;  %v856_v52 = vpop.f32.mrb[13].mxu0 }
 0x53c   :  { %722 = vst [vmem:[#allocation2] sm:$0x3] %v719_v51 }
 0x53d   :  { %909 = shalt.err (!%p906_p4)
}
 0x53e   :  { %s910_s16 = scalar_lea.hbm %s1148_s13, 32 }
 0x53f   :  { %p911_p5 = scmp.ne.s32.totalorder %s1148_s13, %s910_s16  ;;  %p914_p6 = scmp.lt.u32.totalorder %s910_s16, %s1148_s13 }
 0x541   :  { %p916_p7 = pnand %p914_p6, %p911_p5 }
 0x543   :  { %919 = shalt.err (!%p916_p7)
}
 0x544   :  { %732 = dma.vmem_to_hbm [thread:$0]  %s730_s15, 32, %s1148_s13, [#allocation3]  }
 0x545   :  { %920 = dma.done.wait [#allocation3], 32  }
 0x546   :  { %921 = vsyncadd [#allocation3], 4294967264 }
 0x547   :  { %736 = vsyncpa [#allocation3], 1 }

</bundles_post_ra>
